<compile_context>
chip_gen: v6e
topology: v6e:2x2x1
jax: 0.10.0
libtpu: 0.0.40
codegen_flags: <defaults>
</compile_context>

<pallas_src>
import functools

import jax
import jax.numpy as jnp
from jax.experimental import pallas as pl
from jax.experimental.pallas import tpu as pltpu


def _mlp_attention6_kernel(x_ref, wblk_ref, bcat_ref, ones_ref, wfst_ref,
                           bf_ref, out_ref, *, mxu_dtype):
    x = x_ref[...]                                           # (TB, GDp) mxu dtype

    # All six branch linears in ONE lane-dense MXU matmul (block-diag weights),
    # bf16 operands, f32 accumulation.
    h = jnp.dot(x, wblk_ref[...], preferred_element_type=jnp.float32)
    h = h + bcat_ref[...]
    t = jnp.tanh(h)                                          # EUP, f32

    # Per-branch softmax over each D-wide lane segment.
    # tanh bounds the logits to [-1, 1] so exp cannot overflow -> no max-sub.
    e = jnp.exp(t)
    denom = jnp.dot(e.astype(mxu_dtype), ones_ref[...],
                    preferred_element_type=jnp.float32)      # per-segment sums
    s = e * pl.reciprocal(denom, approx=True)                # EUP vrcp

    # softmax-weighted inputs; the branch-sum AND the final linear are folded
    # into a single matmul against Wf_stacked = tile(W_f, (G, 1)).
    p = s * x.astype(jnp.float32)
    out = jnp.dot(p.astype(mxu_dtype), wfst_ref[...],
                  preferred_element_type=jnp.float32)
    out_ref[...] = (out + bf_ref[...]).astype(out_ref.dtype)


def _round_up(x, m):
    return ((x + m - 1) // m) * m


def _padded_feature_dim(gd):
    """Pad GD to the MXU width: 256 on v6e/v7x; keep it unpadded on 128-wide
    MXU chips (v2-v5) where padding 192->256 adds a full extra MXU pass."""
    try:
        kind = jax.devices()[0].device_kind.lower()
    except Exception:
        kind = ""
    if any(v in kind for v in ("v2", "v3", "v4", "v5")):
        return gd
    return _round_up(gd, 256)


def make_mlp_attention6(weights, biases, w_final, b_final, *,
                        tile_b=None, mxu_dtype=jnp.bfloat16):
    """Packs the module parameters ONCE and returns a jitted apply(x1..x6).

    weights: 6 arrays (D, D) laid out for `x @ W` (i.e. torch weight.T).
    biases : 6 arrays (D,).   w_final: (D, D).   b_final: (D,).
    """
    G = len(weights)
    D = weights[0].shape[0]
    GD = G * D
    GDp = _padded_feature_dim(GD)

    # ---- one-time packing (hoisted out of the per-call hot path) -----------
    # Block-diagonal branch weights -> one (GDp, GDp) MXU matmul.
    w_block = jnp.zeros((GDp, GDp), jnp.float32)
    for g, w in enumerate(weights):
        w_block = w_block.at[g * D:(g + 1) * D, g * D:(g + 1) * D].set(
            w.astype(jnp.float32))
    # Block-of-ones -> per-branch softmax denominators in one MXU matmul.
    # Identity on the padded lanes so padded denominators are exactly e_pad=1
    # (no inf/NaN); padded rows of Wf_stacked are zero so they never contribute.
    ones_bd = jnp.zeros((GDp, GDp), jnp.float32)
    ones_bd = ones_bd.at[:GD, :GD].set(
        jnp.kron(jnp.eye(G, dtype=jnp.float32), jnp.ones((D, D), jnp.float32)))
    if GDp > GD:
        ones_bd = ones_bd.at[GD:, GD:].set(jnp.eye(GDp - GD, dtype=jnp.float32))
    # R_tile @ W_f == tile(W_f, (G, 1)) exactly -> fold the two matmuls.
    wf_stacked = jnp.zeros((GDp, D), jnp.float32)
    wf_stacked = wf_stacked.at[:GD, :].set(
        jnp.tile(w_final.astype(jnp.float32), (G, 1)))
    b_cat = jnp.zeros((1, GDp), jnp.float32)
    b_cat = b_cat.at[:, :GD].set(
        jnp.concatenate([b.reshape(1, D) for b in biases],
                        axis=-1).astype(jnp.float32))
    bf2 = b_final.reshape(1, D).astype(jnp.float32)

    # bf16 MXU operands (accumulation stays f32 inside the kernel).
    w_block = w_block.astype(mxu_dtype)
    ones_bd = ones_bd.astype(mxu_dtype)
    wf_stacked = wf_stacked.astype(mxu_dtype)

    kernel = functools.partial(_mlp_attention6_kernel, mxu_dtype=mxu_dtype)

    @jax.jit
    def apply(*xs):
        assert len(xs) == G
        B = xs[0].shape[0]
        out_dtype = xs[0].dtype

        # Stream x in the MXU dtype: halves the only recurring HBM read.
        x_cat = jnp.concatenate(xs, axis=-1)
        if GDp > GD:
            x_cat = jnp.pad(x_cat, ((0, 0), (0, GDp - GD)))
        x_cat = x_cat.astype(mxu_dtype)

        # ---- batch tiling (parallel grid axis) -----------------------------
        tb = tile_b
        if tb is None:
            if B <= 256:
                tb = B            # one step: per-step overhead dominates tiny B
            else:
                tb = B
                # Big tiles amortize the ~0.35us/step overhead; >=2 steps lets
                # the "parallel" axis shard across v7x's two TensorCores.
                for cand in (512, 256, 128, 64, 32, 16, 8):
                    if B % cand == 0 and B // cand >= 2:
                        tb = cand
                        break
        assert B % tb == 0, "B must be a multiple of tile_b"
        grid = (B // tb,)

        row_spec = pl.BlockSpec((tb, GDp), lambda i: (i, 0))
        out_spec = pl.BlockSpec((tb, D), lambda i: (i, 0))

        def resident(shape):   # full-array block, constant index -> VMEM-resident
            return pl.BlockSpec(shape, lambda i: (0,) * len(shape))

        fn = pl.pallas_call(
            kernel,
            out_shape=jax.ShapeDtypeStruct((B, D), out_dtype),
            grid=grid,
            in_specs=[
                row_spec,                 # X_cat      (streamed per batch tile)
                resident((GDp, GDp)),     # W_block    (block-diag branch weights)
                resident((1, GDp)),       # b_cat
                resident((GDp, GDp)),     # ones_bd    (softmax denominators)
                resident((GDp, D)),       # Wf_stacked (= R_tile @ W_f)
                resident((1, D)),         # b_final
            ],
            out_specs=out_spec,
            compiler_params=pltpu.CompilerParams(
                dimension_semantics=("parallel",)),
        )
        return fn(x_cat, w_block, b_cat, ones_bd, wf_stacked, bf2)

    return apply


if __name__ == "__main__":
    B, D = 8, 32  # batch, in_size (nn.Linear(in_size, in_size))
    key = jax.random.PRNGKey(0)
    keys = jax.random.split(key, 20)

    xs = [jax.random.normal(keys[i], (B, D), jnp.float32) for i in range(6)]
    # weights stored as (D_in, D_out), i.e. used as x @ W
    weights = [jax.random.normal(keys[6 + i], (D, D), jnp.float32) / jnp.sqrt(D)
               for i in range(6)]
    biases = [jax.random.normal(keys[12 + i], (D,), jnp.float32) * 0.01
              for i in range(6)]
    w_final = jax.random.normal(keys[18], (D, D), jnp.float32) / jnp.sqrt(D)
    b_final = jax.random.normal(keys[19], (D,), jnp.float32) * 0.01

    apply = make_mlp_attention6(weights, biases, w_final, b_final)
    out = jax.block_until_ready(apply(*xs))

    # Pure-JAX f32 reference (same math as the PyTorch module).
    def ref():
        acc = jnp.zeros((B, D), jnp.float32)
        for x, w, b in zip(xs, weights, biases):
            s = jax.nn.softmax(jnp.tanh(x @ w + b), axis=-1)
            acc = acc + s * x
        return acc @ w_final + b_final

    ref_out = ref()
    max_err = float(jnp.max(jnp.abs(out - ref_out)))
    # Tolerance covers bf16 MXU operands (with f32 accumulation) + approx EUP
    # reciprocal, compared against the pure-f32 reference.
    assert jnp.allclose(out, ref_out, atol=3e-2, rtol=3e-2), max_err

    print("KERNEL_OK")
</pallas_src>

<mosaic_0001>
module attributes {stable_mosaic.version = 11 : i64} {
  func.func @_mlp_attention6_kernel(%arg0: i32, %arg1: memref<8x256xbf16, #tpu.memory_space<vmem>>, %arg2: memref<256x256xbf16, #tpu.memory_space<vmem>>, %arg3: memref<1x256xf32, #tpu.memory_space<vmem>>, %arg4: memref<256x256xbf16, #tpu.memory_space<vmem>>, %arg5: memref<256x32xbf16, #tpu.memory_space<vmem>>, %arg6: memref<1x32xf32, #tpu.memory_space<vmem>>, %arg7: memref<8x32xf32, #tpu.memory_space<vmem>>) attributes {dimension_semantics = [#tpu.dimension_semantics<parallel>], iteration_bounds = array<i64: 1>, scalar_prefetch = 0 : i64, scratch_operands = 0 : i64, tpu.core_type = #tpu.core_type<tc>, window_params = [{transform_indices = @transform_0, window_bounds = array<i64: 8, 256>}, {pipeline_mode = #tpu.pipeline_mode<synchronous>, transform_indices = @transform_1, window_bounds = array<i64: 256, 256>}, {pipeline_mode = #tpu.pipeline_mode<synchronous>, transform_indices = @transform_2, window_bounds = array<i64: 1, 256>}, {pipeline_mode = #tpu.pipeline_mode<synchronous>, transform_indices = @transform_3, window_bounds = array<i64: 256, 256>}, {pipeline_mode = #tpu.pipeline_mode<synchronous>, transform_indices = @transform_4, window_bounds = array<i64: 256, 32>}, {pipeline_mode = #tpu.pipeline_mode<synchronous>, transform_indices = @transform_5, window_bounds = array<i64: 1, 32>}, {transform_indices = @transform_6, window_bounds = array<i64: 8, 32>}]} {
    %c0 = arith.constant 0 : index
    %c0_0 = arith.constant 0 : index
    %0 = vector.load %arg1[%c0, %c0_0] : memref<8x256xbf16, #tpu.memory_space<vmem>>, vector<8x256xbf16>
    %c0_1 = arith.constant 0 : index
    %c0_2 = arith.constant 0 : index
    %1 = vector.load %arg2[%c0_1, %c0_2] : memref<256x256xbf16, #tpu.memory_space<vmem>>, vector<256x256xbf16>
    %cst = arith.constant dense<0.000000e+00> : vector<8x256xf32>
    %2 = tpu.matmul %0, %1, %cst {dimension_numbers = #tpu.dot_dimension_numbers<[1], [0], [0], [1], [0, 0, 1, 1], [], []>} : vector<8x256xbf16>, vector<256x256xbf16>, vector<8x256xf32> -> vector<8x256xf32>
    %c0_3 = arith.constant 0 : index
    %c0_4 = arith.constant 0 : index
    %3 = vector.load %arg3[%c0_3, %c0_4] : memref<1x256xf32, #tpu.memory_space<vmem>>, vector<1x256xf32>
    %4 = vector.broadcast %3 : vector<1x256xf32> to vector<8x256xf32>
    %5 = arith.addf %2, %4 : vector<8x256xf32>
    %6 = math.tanh %5 : vector<8x256xf32>
    %7 = math.exp %6 : vector<8x256xf32>
    %8 = arith.truncf %7 : vector<8x256xf32> to vector<8x256xbf16>
    %c0_5 = arith.constant 0 : index
    %c0_6 = arith.constant 0 : index
    %9 = vector.load %arg4[%c0_5, %c0_6] : memref<256x256xbf16, #tpu.memory_space<vmem>>, vector<256x256xbf16>
    %cst_7 = arith.constant dense<0.000000e+00> : vector<8x256xf32>
    %10 = tpu.matmul %8, %9, %cst_7 {dimension_numbers = #tpu.dot_dimension_numbers<[1], [0], [0], [1], [0, 0, 1, 1], [], []>} : vector<8x256xbf16>, vector<256x256xbf16>, vector<8x256xf32> -> vector<8x256xf32>
    %11 = tpu.reciprocal %10 {approx = true} : vector<8x256xf32> -> vector<8x256xf32>
    %12 = arith.mulf %7, %11 : vector<8x256xf32>
    %13 = arith.extf %0 : vector<8x256xbf16> to vector<8x256xf32>
    %14 = arith.mulf %12, %13 : vector<8x256xf32>
    %15 = arith.truncf %14 : vector<8x256xf32> to vector<8x256xbf16>
    %c0_8 = arith.constant 0 : index
    %c0_9 = arith.constant 0 : index
    %16 = vector.load %arg5[%c0_8, %c0_9] : memref<256x32xbf16, #tpu.memory_space<vmem>>, vector<256x32xbf16>
    %cst_10 = arith.constant dense<0.000000e+00> : vector<8x32xf32>
    %17 = tpu.matmul %15, %16, %cst_10 {dimension_numbers = #tpu.dot_dimension_numbers<[1], [0], [0], [1], [0, 0, 1, 1], [], []>} : vector<8x256xbf16>, vector<256x32xbf16>, vector<8x32xf32> -> vector<8x32xf32>
    %c0_11 = arith.constant 0 : index
    %c0_12 = arith.constant 0 : index
    %18 = vector.load %arg6[%c0_11, %c0_12] : memref<1x32xf32, #tpu.memory_space<vmem>>, vector<1x32xf32>
    %19 = vector.broadcast %18 : vector<1x32xf32> to vector<8x32xf32>
    %20 = arith.addf %17, %19 : vector<8x32xf32>
    %c0_13 = arith.constant 0 : index
    %c0_14 = arith.constant 0 : index
    %21 = vector.load %arg7[%c0_13, %c0_14] : memref<8x32xf32, #tpu.memory_space<vmem>>, vector<8x32xf32>
    tpu.vector_store %arg7[%c0_13, %c0_14], %20 {strides = array<i32>} : memref<8x32xf32, #tpu.memory_space<vmem>>, vector<8x32xf32>,
    return
  }
  func.func @transform_0(%arg0: i32) -> (i32, i32) {
    %c0_i32 = arith.constant 0 : i32
    %c0_i32_0 = arith.constant 0 : i32
    return %arg0, %c0_i32 : i32, i32
  }
  func.func @transform_1(%arg0: i32) -> (i32, i32) {
    %c0_i32 = arith.constant 0 : i32
    %c0_i32_0 = arith.constant 0 : i32
    %c0_i32_1 = arith.constant 0 : i32
    return %c0_i32, %c0_i32_0 : i32, i32
  }
  func.func @transform_2(%arg0: i32) -> (i32, i32) {
    %c0_i32 = arith.constant 0 : i32
    %c0_i32_0 = arith.constant 0 : i32
    %c0_i32_1 = arith.constant 0 : i32
    return %c0_i32, %c0_i32_0 : i32, i32
  }
  func.func @transform_3(%arg0: i32) -> (i32, i32) {
    %c0_i32 = arith.constant 0 : i32
    %c0_i32_0 = arith.constant 0 : i32
    %c0_i32_1 = arith.constant 0 : i32
    return %c0_i32, %c0_i32_0 : i32, i32
  }
  func.func @transform_4(%arg0: i32) -> (i32, i32) {
    %c0_i32 = arith.constant 0 : i32
    %c0_i32_0 = arith.constant 0 : i32
    %c0_i32_1 = arith.constant 0 : i32
    return %c0_i32, %c0_i32_0 : i32, i32
  }
  func.func @transform_5(%arg0: i32) -> (i32, i32) {
    %c0_i32 = arith.constant 0 : i32
    %c0_i32_0 = arith.constant 0 : i32
    %c0_i32_1 = arith.constant 0 : i32
    return %c0_i32, %c0_i32_0 : i32, i32
  }
  func.func @transform_6(%arg0: i32) -> (i32, i32) {
    %c0_i32 = arith.constant 0 : i32
    %c0_i32_0 = arith.constant 0 : i32
    return %arg0, %c0_i32 : i32, i32
  }
}

</mosaic_0001>

<bundles_post_ra>
// kernel: apply.1
= control target key start
LH: loop header
LB: loop body
LE: loop exit
PB: predicated region body
PF: predicated region fallthrough
CT: control target
= control target key end

     0   :  { %11 = vsyncpa [#allocation3], 0  ;;  %s1166_s0 = inlined_call_operand.vmem [shape: bf16[8,256], index: 0, kind: input, shape index: {}]   ;;  %s1167_s1 = inlined_call_operand.hbm [shape: bf16[256,256], index: 1, kind: input, shape index: {}]   ;;  %s1168_s2 = inlined_call_operand.vmem [shape: f32[1,256], index: 2, kind: input, shape index: {}]   ;;  %s1169_s3 = inlined_call_operand.hbm [shape: bf16[256,256], index: 3, kind: input, shape index: {}]   ;;  %s1170_s4 = inlined_call_operand.vmem [shape: bf16[256,32], index: 4, kind: input, shape index: {}]   ;;  %s1171_s5 = inlined_call_operand.vmem [shape: f32[1,32], index: 5, kind: input, shape index: {}]   ;;  %s1172_s6 = inlined_call_operand.hbm [shape: f32[8,32], index: 6, kind: output, shape index: {}]  }
   0x1   :  { %12 = vsyncpa [#allocation6], 0 }
   0x2   :  { %13 = vsyncpa [#allocation4], 0  ;;  %s1052_s21 = smov [#allocation2]  }
   0x3   :  { %s21_s22 = sshll.u32 %s1052_s21, 4  ;;  %s22_s22 = int_to_ptr.vmem [resolvable:$true] %s21_s22 }
   0x4   :  { %s994_s23 = scalar_lea.vmem %s22_s22, 4096  ;;  %p999_p1 = scmp.lt.s32.totalorder %s22_s22, %s22_s22 }
   0x5   :  { %p995_p0 = scmp.ne.s32.totalorder %s22_s22, %s994_s23  ;;  %p1000_p2 = scmp.lt.s32.totalorder %s994_s23, %s994_s23 }
   0x7   :  { %p1001_p3 = por %p1000_p2, %p999_p1 }
   0x9   :  { %p1002_p4 = pnand %p1001_p3, %p995_p0 }
   0xb   :  { %1005 = shalt.err (!%p1002_p4)
}
   0xc   :  { %s1053_s24 = smov 128   ;;  %s1054_s25 = smov 8  }
   0xd   :  { %27 = dma.hbm_to_vmem [thread:$0]  %s1167_s1, 4096, %s22_s22, [#allocation3], %s1053_s24, %s1053_s24, %s1054_s25  }
   0xe   :  { %s1055_s28 = smov [#allocation5]  }
   0xf   :  { %s35_s29 = sshll.u32 %s1055_s28, 4  ;;  %s36_s29 = int_to_ptr.vmem [resolvable:$true] %s35_s29 }
  0x10   :  { %s1014_s30 = scalar_lea.vmem %s36_s29, 4096  ;;  %p1019_p6 = scmp.lt.s32.totalorder %s36_s29, %s36_s29 }
  0x11   :  { %p1015_p5 = scmp.ne.s32.totalorder %s36_s29, %s1014_s30  ;;  %p1020_p7 = scmp.lt.s32.totalorder %s1014_s30, %s1014_s30 }
  0x13   :  { %p1021_p8 = por %p1020_p7, %p1019_p6 }
  0x15   :  { %p1022_p9 = pnand %p1021_p8, %p1015_p5 }
  0x17   :  { %1025 = shalt.err (!%p1022_p9)
}
  0x18   :  { %41 = dma.hbm_to_vmem [thread:$0]  %s1169_s3, 4096, %s36_s29, [#allocation6], %s1053_s24, %s1053_s24, %s1054_s25  }
  0x19   :  { %1046 = dma.done.wait [#allocation3], 4096  }
  0x1a   :  { %1047 = vsyncadd [#allocation3], 4294963200 }
  0x1b   :  { %1048 = dma.done.wait [#allocation6], 4096  }
  0x1c   :  { %1049 = vsyncadd [#allocation6], 4294963200  ;;  %v860_v0 = vld [vmem:[#allocation2 + $0x74] ss:$8 sps:$4 sm:$0xff]   ;;  %v862_v1 = vld [vmem:[#allocation2 + $0x70] ss:$8 sps:$4 sm:$0xff]  }
  0x1d   :  { %265 = vmatprep.subr.bf16.mxu0 %v860_v0  ;;  %v863_v2 = vld [vmem:[#allocation2 + $0x64] ss:$8 sps:$4 sm:$0xff]   ;;  %v865_v3 = vld [vmem:[#allocation2 + $0x60] ss:$8 sps:$4 sm:$0xff]   ;;  %v866_v4 = vld [vmem:[#allocation2 + $0x54] ss:$8 sps:$4 sm:$0xff]  }
  0x1e   :  { %266 = vmatpush1.bf16.msra.mxu0 %v862_v1  ;;  %v868_v5 = vld [vmem:[#allocation2 + $0x50] ss:$8 sps:$4 sm:$0xff]   ;;  %v869_v6 = vld [vmem:[#allocation2 + $0x44] ss:$8 sps:$4 sm:$0xff]   ;;  %v871_v7 = vld [vmem:[#allocation2 + $0x40] ss:$8 sps:$4 sm:$0xff]  }
  0x1f   :  { %267 = vmatprep.subr.bf16.mxu0 %v863_v2  ;;  %v872_v8 = vld [vmem:[#allocation2 + $0x34] ss:$8 sps:$4 sm:$0xff]   ;;  %v874_v9 = vld [vmem:[#allocation2 + $0x30] ss:$8 sps:$4 sm:$0xff]   ;;  %v875_v10 = vld [vmem:[#allocation2 + $0x24] ss:$8 sps:$4 sm:$0xff]  }
  0x20   :  { %v877_v11 = vld [vmem:[#allocation2 + $0x20] ss:$8 sps:$4 sm:$0xff]   ;;  %v878_v12 = vld [vmem:[#allocation2 + $0x14] ss:$8 sps:$4 sm:$0xff]   ;;  %v880_v13 = vld [vmem:[#allocation2 + $0x10] ss:$8 sps:$4 sm:$0xff]  }
  0x21   :  { %v1101_v14 = vld [vmem:[%s1166_s0] sm:$0xff]  ;;  %v910_v16 = vld [vmem:[#allocation5 + $0x74] ss:$8 sps:$4 sm:$0xff]   ;;  %v912_v17 = vld [vmem:[#allocation5 + $0x70] ss:$8 sps:$4 sm:$0xff]   ;;  %s1056_s15 = smov [#allocation7]  }
  0x22   :  { %268 = vmatpush1.bf16.msra.mxu0 %v865_v3  ;;  %v751_v15 = vcombine.high %v1101_v14, %v1101_v14  ;;  %v913_v18 = vld [vmem:[#allocation5 + $0x64] ss:$8 sps:$4 sm:$0xff]   ;;  %506 = vmatprep.subr.bf16.mxu1 %v910_v16  ;;  %v883_v20 = vld [vmem:[#allocation2] ss:$8 sps:$4 sm:$0xff]   ;;  %v916_v22 = vld [vmem:[#allocation5 + $0x54] ss:$8 sps:$4 sm:$0xff]   ;;  %v750_v48 = vcombine.low %v1101_v14, %v1101_v14 }
  0x23   :  { %269 = vmatprep.subr.bf16.mxu0 %v866_v4  ;;  %v881_v19 = vld [vmem:[#allocation2 + $0x4] ss:$8 sps:$4 sm:$0xff]   ;;  %507 = vmatpush1.bf16.msra.mxu1 %v912_v17  ;;  %v915_v21 = vld [vmem:[#allocation5 + $0x60] ss:$8 sps:$4 sm:$0xff]   ;;  %v884_v23 = vld [vmem:[#allocation2 + $0xf4] ss:$8 sps:$4 sm:$0xff]  }
  0x24   :  { %297 = vmatprep.mubr.bf16.mxu0 %v751_v15  ;;  %508 = vmatprep.subr.bf16.mxu1 %v913_v18  ;;  %v886_v24 = vld [vmem:[#allocation2 + $0xf0] ss:$8 sps:$4 sm:$0xff]   ;;  %v887_v25 = vld [vmem:[#allocation2 + $0xe4] ss:$8 sps:$4 sm:$0xff]   ;;  %v921_v28 = vld [vmem:[#allocation5 + $0x40] ss:$8 sps:$4 sm:$0xff]  }
  0x25   :  { %v918_v26 = vld [vmem:[#allocation5 + $0x50] ss:$8 sps:$4 sm:$0xff]   ;;  %v919_v27 = vld [vmem:[#allocation5 + $0x44] ss:$8 sps:$4 sm:$0xff]   ;;  %v889_v29 = vld [vmem:[#allocation2 + $0xe0] ss:$8 sps:$4 sm:$0xff]  }
  0x26   :  { %270 = vmatpush1.bf16.msra.mxu0 %v868_v5  ;;  %v922_v30 = vld [vmem:[#allocation5 + $0x34] ss:$8 sps:$4 sm:$0xff]   ;;  %v924_v32 = vld [vmem:[#allocation5 + $0x30] ss:$8 sps:$4 sm:$0xff]   ;;  %v925_v34 = vld [vmem:[#allocation5 + $0x24] ss:$8 sps:$4 sm:$0xff]  }
  0x27   :  { %271 = vmatprep.subr.bf16.mxu0 %v869_v6  ;;  %509 = vmatpush1.bf16.msra.mxu1 %v915_v21  ;;  %v890_v31 = vld [vmem:[#allocation2 + $0xd4] ss:$8 sps:$4 sm:$0xff]   ;;  %v892_v33 = vld [vmem:[#allocation2 + $0xd0] ss:$8 sps:$4 sm:$0xff]   ;;  %v893_v35 = vld [vmem:[#allocation2 + $0xc4] ss:$8 sps:$4 sm:$0xff]  }
  0x28   :  { %510 = vmatprep.subr.bf16.mxu1 %v916_v22  ;;  %v927_v36 = vld [vmem:[#allocation5 + $0x20] ss:$8 sps:$4 sm:$0xff]   ;;  %v928_v38 = vld [vmem:[#allocation5 + $0x14] ss:$8 sps:$4 sm:$0xff]   ;;  %v930_v40 = vld [vmem:[#allocation5 + $0x10] ss:$8 sps:$4 sm:$0xff]  }
  0x29   :  { %v895_v37 = vld [vmem:[#allocation2 + $0xc0] ss:$8 sps:$4 sm:$0xff]   ;;  %v896_v39 = vld [vmem:[#allocation2 + $0xb4] ss:$8 sps:$4 sm:$0xff]   ;;  %v898_v41 = vld [vmem:[#allocation2 + $0xb0] ss:$8 sps:$4 sm:$0xff]  }
  0x2a   :  { %272 = vmatpush1.bf16.msra.mxu0 %v871_v7  ;;  %v899_v42 = vld [vmem:[#allocation2 + $0xa4] ss:$8 sps:$4 sm:$0xff]   ;;  %v901_v43 = vld [vmem:[#allocation2 + $0xa0] ss:$8 sps:$4 sm:$0xff]   ;;  %v902_v44 = vld [vmem:[#allocation2 + $0x94] ss:$8 sps:$4 sm:$0xff]   ;;  %v88_v7 = vlaneseq }
  0x2b   :  { %273 = vmatprep.subr.bf16.mxu0 %v872_v8  ;;  %511 = vmatpush1.bf16.msra.mxu1 %v918_v26  ;;  %v904_v45 = vld [vmem:[#allocation2 + $0x90] ss:$8 sps:$4 sm:$0xff]   ;;  %v905_v46 = vld [vmem:[#allocation2 + $0x84] ss:$8 sps:$4 sm:$0xff]   ;;  %v907_v47 = vld [vmem:[#allocation2 + $0x80] ss:$8 sps:$4 sm:$0xff]  }
  0x2c   :  { %512 = vmatprep.subr.bf16.mxu1 %v919_v27  ;;  %v931_v49 = vld [vmem:[#allocation5 + $0x4] ss:$8 sps:$4 sm:$0xff]   ;;  %v933_v50 = vld [vmem:[#allocation5] ss:$8 sps:$4 sm:$0xff]   ;;  %v934_v51 = vld [vmem:[#allocation5 + $0xf4] ss:$8 sps:$4 sm:$0xff]  }
  0x2d   :  { %v936_v52 = vld [vmem:[#allocation5 + $0xf0] ss:$8 sps:$4 sm:$0xff]   ;;  %v937_v53 = vld [vmem:[#allocation5 + $0xe4] ss:$8 sps:$4 sm:$0xff]   ;;  %v939_v54 = vld [vmem:[#allocation5 + $0xe0] ss:$8 sps:$4 sm:$0xff]  }
  0x2e   :  { %274 = vmatpush1.bf16.msra.mxu0 %v874_v9  ;;  %v940_v55 = vld [vmem:[#allocation5 + $0xd4] ss:$8 sps:$4 sm:$0xff]   ;;  %v942_v56 = vld [vmem:[#allocation5 + $0xd0] ss:$8 sps:$4 sm:$0xff]   ;;  %v943_v57 = vld [vmem:[#allocation5 + $0xc4] ss:$8 sps:$4 sm:$0xff]  }
  0x2f   :  { %275 = vmatprep.subr.bf16.mxu0 %v875_v10  ;;  %513 = vmatpush1.bf16.msra.mxu1 %v921_v28  ;;  %v945_v58 = vld [vmem:[#allocation5 + $0xc0] ss:$8 sps:$4 sm:$0xff]   ;;  %v946_v59 = vld [vmem:[#allocation5 + $0xb4] ss:$8 sps:$4 sm:$0xff]   ;;  %v948_v60 = vld [vmem:[#allocation5 + $0xb0] ss:$8 sps:$4 sm:$0xff]  }
  0x30   :  { %514 = vmatprep.subr.bf16.mxu1 %v922_v30  ;;  %v949_v61 = vld [vmem:[#allocation5 + $0xa4] ss:$8 sps:$4 sm:$0xff]   ;;  %v951_v62 = vld [vmem:[#allocation5 + $0xa0] ss:$8 sps:$4 sm:$0xff]   ;;  %v952_v63 = vld [vmem:[#allocation5 + $0x94] ss:$8 sps:$4 sm:$0xff]  }
  0x31   :  { %v954_v0 = vld [vmem:[#allocation5 + $0x90] ss:$8 sps:$4 sm:$0xff]   ;;  %v955_v1 = vld [vmem:[#allocation5 + $0x84] ss:$8 sps:$4 sm:$0xff]   ;;  %v957_v2 = vld [vmem:[#allocation5 + $0x80] ss:$8 sps:$4 sm:$0xff]  }
  0x32   :  { %276 = vmatpush1.bf16.msra.mxu0 %v877_v11  ;;  %v958_v3 = vld [vmem:[%s1170_s4 + $0x78] sm:$0xff]   ;;  %v960_v5 = vld [vmem:[%s1170_s4 + $0x70] sm:$0xff]   ;;  %v89_v8 = vshrl.u32 %v88_v7, 7  ;;  %v86_v10 = vld [vmem:[%s1168_s2] sm:$0x3]  ;;  %s740_s16 = sshll.u32 %s1056_s15, 4  ;;  %s741_s16 = int_to_ptr.vmem [resolvable:$true] %s740_s16 }
  0x33   :  { %277 = vmatprep.subr.bf16.mxu0 %v878_v12  ;;  %515 = vmatpush1.bf16.msra.mxu1 %v924_v32  ;;  %v959_v4 = vld [vmem:[%s1170_s4 + $0x38] sm:$0xff]   ;;  %v961_v6 = vld [vmem:[%s1170_s4 + $0x30] sm:$0xff]   ;;  %v963_v30 = vld [vmem:[%s1170_s4 + $0x28] sm:$0xff]   ;;  %vm732_vm0 = vcmask 261120   ;;  %s1026_s17 = scalar_lea.vmem %s741_s16, 128  ;;  %p1031_p11 = scmp.lt.s32.totalorder %s741_s16, %s741_s16 }
  0x34   :  { %516 = vmatprep.subr.bf16.mxu1 %v925_v34  ;;  %v90_v9 = vsub.s32 0, %v89_v8  ;;  %v94_v11 = vsub.s32 1, %v89_v8  ;;  %v965_v32 = vld [vmem:[%s1170_s4 + $0x20] sm:$0xff]   ;;  %v967_v34 = vld [vmem:[%s1170_s4 + $0x18] sm:$0xff]   ;;  %p1027_p10 = scmp.ne.s32.totalorder %s741_s16, %s1026_s17  ;;  %p1032_p12 = scmp.lt.s32.totalorder %s1026_s17, %s1026_s17 }
  0x36   :  { %278 = vmatpush1.bf16.msra.mxu0 %v880_v13  ;;  %v91_v12 = vrot.slane %v86_v10, %v90_v9  ;;  %v95_v13 = vrot.slane %v86_v10, %v94_v11  ;;  %p1033_p13 = por %p1032_p12, %p1031_p11 }
  0x37   :  { %279 = vmatprep.subr.bf16.mxu0 %v881_v19  ;;  %517 = vmatpush1.bf16.msra.mxu1 %v927_v36  ;;  %v969_v36 = vld [vmem:[%s1170_s4 + $0x10] sm:$0xff]  }
  0x38   :  { %518 = vmatprep.subr.bf16.mxu1 %v928_v38  ;;  %v971_v38 = vld [vmem:[%s1170_s4 + $0x8] sm:$0xff]   ;;  %p1034_p0 = pnand %p1033_p13, %p1027_p10 }
  0x3a   :  { %280 = vmatpush1.bf16.msra.mxu0 %v883_v20 }
  0x3b   :  { %281 = vmatprep.subr.bf16.mxu0 %v884_v23  ;;  %519 = vmatpush1.bf16.msra.mxu1 %v930_v40  ;;  %v973_v40 = vld [vmem:[%s1170_s4] sm:$0xff]  }
  0x3c   :  { %520 = vmatprep.subr.bf16.mxu1 %v931_v49 }
  0x3e   :  { %282 = vmatpush2.bf16.msra.mxu0 %v886_v24 }
  0x3f   :  { %283 = vmatprep.subr.bf16.mxu0 %v887_v25  ;;  %521 = vmatpush1.bf16.msra.mxu1 %v933_v50 }
  0x40   :  { %522 = vmatprep.subr.bf16.mxu1 %v934_v51 }
  0x42   :  { %284 = vmatpush2.bf16.msra.mxu0 %v889_v29  ;;  %v962_v29 = vld [vmem:[%s1170_s4 + $0x68] sm:$0xff]  }
  0x43   :  { %285 = vmatprep.subr.bf16.mxu0 %v890_v31  ;;  %523 = vmatpush2.bf16.msra.mxu1 %v936_v52  ;;  %v964_v31 = vld [vmem:[%s1170_s4 + $0x60] sm:$0xff]  }
  0x44   :  { %524 = vmatprep.subr.bf16.mxu1 %v937_v53 }
  0x46   :  { %286 = vmatpush2.bf16.msra.mxu0 %v892_v33  ;;  %v966_v33 = vld [vmem:[%s1170_s4 + $0x58] sm:$0xff]  }
  0x47   :  { %287 = vmatprep.subr.bf16.mxu0 %v893_v35  ;;  %525 = vmatpush2.bf16.msra.mxu1 %v939_v54  ;;  %v968_v35 = vld [vmem:[%s1170_s4 + $0x50] sm:$0xff]  }
  0x48   :  { %526 = vmatprep.subr.bf16.mxu1 %v940_v55 }
  0x4a   :  { %288 = vmatpush2.bf16.msra.mxu0 %v895_v37  ;;  %v970_v37 = vld [vmem:[%s1170_s4 + $0x48] sm:$0xff]  }
  0x4b   :  { %289 = vmatprep.subr.bf16.mxu0 %v896_v39  ;;  %527 = vmatpush2.bf16.msra.mxu1 %v942_v56  ;;  %v972_v39 = vld [vmem:[%s1170_s4 + $0x40] sm:$0xff]  }
  0x4c   :  { %528 = vmatprep.subr.bf16.mxu1 %v943_v57  ;;  %v816_v56 = vld [vmem:[%s1171_s5] ss:$0 sm:$0xff] }
  0x4e   :  { %290 = vmatpush2.bf16.msra.mxu0 %v898_v41 }
  0x4f   :  { %291 = vmatprep.subr.bf16.mxu0 %v899_v42  ;;  %529 = vmatpush2.bf16.msra.mxu1 %v945_v58 }
  0x50   :  { %530 = vmatprep.subr.bf16.mxu1 %v946_v59 }
  0x52   :  { %292 = vmatpush2.bf16.msra.mxu0 %v901_v43 }
  0x53   :  { %293 = vmatprep.subr.bf16.mxu0 %v902_v44  ;;  %531 = vmatpush2.bf16.msra.mxu1 %v948_v60 }
  0x54   :  { %532 = vmatprep.subr.bf16.mxu1 %v949_v61 }
  0x56   :  { %294 = vmatpush2.bf16.msra.mxu0 %v904_v45 }
  0x57   :  { %295 = vmatprep.subr.bf16.mxu0 %v905_v46  ;;  %533 = vmatpush2.bf16.msra.mxu1 %v951_v62  ;;  %v551_v46 = vunpack.c.l.bf16 %v1101_v14 }
  0x58   :  { %534 = vmatprep.subr.bf16.mxu1 %v952_v63 }
  0x5a   :  { %296 = vmatpush2.bf16.msra.mxu0 %v907_v47  ;;  %v552_v47 = vunpack.c.h.bf16 %v1101_v14 }
  0x5b   :  { %535 = vmatpush2.bf16.msra.mxu1 %v954_v0  ;;  %833 = vmatprep.subr.bf16.mxu0 %v958_v3 }
  0x5c   :  { %536 = vmatprep.subr.bf16.mxu1 %v955_v1 }
  0x5d   :  { %298 = vmatmul.mubr.bf16.vlgmr.msra.gmra.mxu0 %v750_v48 }
  0x5e   :  { %834 = vmatpush3.bf16.msra.mxu0 %v959_v4 }
  0x5f   :  { %537 = vmatpush2.bf16.msra.mxu1 %v957_v2  ;;  %835 = vmatprep.subr.bf16.mxu0 %v960_v5 }
  0x62   :  { %836 = vmatpush3.bf16.msra.mxu0 %v961_v6 }
  0x63   :  { %837 = vmatprep.subr.bf16.mxu0 %v962_v29 }
  0x66   :  { %838 = vmatpush3.bf16.msra.mxu0 %v963_v30 }
  0x67   :  { %839 = vmatprep.subr.bf16.mxu0 %v964_v31 }
  0x6a   :  { %840 = vmatpush3.bf16.msra.mxu0 %v965_v32 }
  0x6b   :  { %841 = vmatprep.subr.bf16.mxu0 %v966_v33 }
  0x6e   :  { %842 = vmatpush3.bf16.msra.mxu0 %v967_v34 }
  0x6f   :  { %843 = vmatprep.subr.bf16.mxu0 %v968_v35 }
  0x72   :  { %844 = vmatpush3.bf16.msra.mxu0 %v969_v36 }
  0x73   :  { %845 = vmatprep.subr.bf16.mxu0 %v970_v37 }
  0x76   :  { %846 = vmatpush3.bf16.msra.mxu0 %v971_v38 }
  0x77   :  { %847 = vmatprep.subr.bf16.mxu0 %v972_v39 }
  0x7a   :  { %848 = vmatpush3.bf16.msra.mxu0 %v973_v40 }
 0x11d   :  { %v299_v15 = vpop.f32.mrf.mxu0 }
 0x11e   :  { %v300_v16 = vadd.f32 %v299_v15, %v91_v12 }
 0x11f   :  { %v301_v17 = vpop.f32.mrf.mxu0 }
 0x120   :  { %974 = vtanh.f32 %v300_v16  ;;  %v302_v18 = vadd.f32 %v301_v17, %v95_v13 }
 0x121   :  { %v303_v19 = vpop.f32.mrf.mxu0 }
 0x122   :  { %976 = vtanh.f32 %v302_v18 }
 0x123   :  { %v304_v20 = vpop.f32.mrf.mxu0 }
 0x12d   :  { %v975_v21 = vpop.eup %974 }
 0x12e   :  { %v308_v22 = vmul.f32 1.442695, %v975_v21 }
 0x12f   :  { %v977_v23 = vpop.eup %976 }
 0x130   :  { %v310_v24 = vmul.f32 1.442695, %v977_v23  ;;  %978 = vpow2.f32 %v308_v22 }
 0x132   :  { %980 = vpow2.f32 %v310_v24 }
 0x13d   :  { %v979_v25 = vpop.eup %978 }
 0x13e   :  { %v312_v28 = vpack.c.bf16 %v979_v25, %v979_v25 }
 0x13f   :  { %v981_v26 = vpop.eup %980 }
 0x140   :  { %v313_v27 = vpack.c.bf16 %v981_v26, %v981_v26 }
 0x142   :  { %538 = vmatprep.mubr.bf16.mxu1 %v313_v27 }
 0x143   :  { %539 = vmatmul.mubr.bf16.vlgmr.msra.gmra.mxu1 %v312_v28 }
 0x203   :  { %v540_v41 = vpop.f32.mrf.mxu1 }
 0x204   :  { %982 = vrcp.f32 %v540_v41 }
 0x205   :  { %v542_v42 = vpop.f32.mrf.mxu1 }
 0x206   :  { %984 = vrcp.f32 %v542_v42 }
 0x207   :  { %v544_v43 = vpop.f32.mrf.mxu1 }
 0x209   :  { %v545_v44 = vpop.f32.mrf.mxu1 }
 0x211   :  { %v983_v45 = vpop.eup %982 }
 0x212   :  { %v549_v48 = vmul.f32 %v983_v45, %v979_v25 }
 0x213   :  { %v985_v49 = vpop.eup %984 }
 0x214   :  { %v550_v50 = vmul.f32 %v985_v49, %v981_v26  ;;  %v553_v51 = vmul.f32 %v551_v46, %v549_v48 }
 0x216   :  { %v554_v52 = vmul.f32 %v552_v47, %v550_v50  ;;  %v555_v54 = vpack.c.bf16 %v553_v51, %v553_v51 }
 0x218   :  { %v556_v53 = vpack.c.bf16 %v554_v52, %v554_v52 }
 0x21a   :  { %724 = vmatprep.mubr.bf16.mxu0 %v556_v53 }
 0x21b   :  { %725 = vmatmul.mubr.bf16.vlgmr.msra.gmra.mxu0 %v555_v54 }
 0x2db   :  { %v849_v55 = vpop.f32.mrf.mxu0 }
 0x2dd   :  { %v850_v57 = vpop.f32.mrf.mxu0 }
 0x2de   :  { %v851_v58 = vadd.f32 %v850_v57, %v849_v55 }
 0x2df   :  { %v852_v59 = vpop.f32.mrf.mxu0 }
 0x2e0   :  { %v727_v14 = vadd.f32 %v851_v58, %v816_v56 }
 0x2e1   :  { %v853_v60 = vpop.f32.mrf.mxu0 }
 0x2e2   :  { %733 = vst.msk [vmem:[#allocation7] sm:$0xff] %vm732_vm0, %v727_v14 }
 0x2e3   :  { %1037 = shalt.err (!%p1034_p0)
}
 0x2e4   :  { %743 = dma.vmem_to_hbm [thread:$0]  %s741_s16, 128, %s1172_s6, [#allocation4]  }
 0x2e5   :  { %1050 = dma.done.wait [#allocation4], 128  }
 0x2e6   :  { %1051 = vsyncadd [#allocation4], 4294967168 }
 0x2e7   :  { %747 = vsyncpa [#allocation3], 1 }
 0x2e8   :  { %748 = vsyncpa [#allocation6], 1 }
 0x2e9   :  { %749 = vsyncpa [#allocation4], 1 }

</bundles_post_ra>
